<compile_context>
chip_gen: v5e
topology: v5e:2x2
jax: 0.10.0
libtpu: 0.0.40
codegen_flags: <defaults>
</compile_context>

<pallas_src>
import functools

import numpy as np
import jax
import jax.numpy as jnp
from jax.experimental import pallas as pl
from jax.experimental.pallas import tpu as pltpu

NEG_BIG = 1000000000.0


# --------------------------------------------------------------------------
# Fused context-attention kernel (one batch tile per grid step).
# --------------------------------------------------------------------------
def context_attention_kernel(feat_ref, ctx_ref, mask_ref, wkv_ref, wq_ref,
                             out_ref, score_ref, *, scale):
    # feat_ref : [TB*Sp, D+1] bf16     ctx_ref : [TB, Dh+1] bf16   mask_ref : [TB, Sp] f32
    # wkv_ref  : [D+1, 2*Dh]  bf16     wq_ref  : [Dh+1, Dh] bf16
    # out_ref  : [TB, Dh] f32          score_ref: [TB, Sp] f32
    tb, dh = out_ref.shape
    sp = mask_ref.shape[-1]

    # Fused K/V projection: one wide MXU matmul (M = TB*Sp), bias folded into wkv, f32 acc.
    kv = jnp.dot(feat_ref[...], wkv_ref[...],
                 preferred_element_type=jnp.float32)          # [TB*Sp, 2*Dh]
    k = kv[:, :dh].reshape(tb, sp, dh)                        # [TB, Sp, Dh]  (free split, Sp%8==0)
    v = kv[:, dh:].reshape(tb, sp, dh)                        # [TB, Sp, Dh]

    # Query projection: one M = TB matmul, bias folded into wq.
    q = jnp.dot(ctx_ref[...], wq_ref[...],
                preferred_element_type=jnp.float32)           # [TB, Dh]

    # ratio[b, s] = scale * <k[b, s, :], q[b, :]>  (VPU broadcast-mul + XLU lane reduce).
    ratio = jnp.sum(k * q[:, None, :], axis=-1) * scale       # [TB, Sp]

    # Masking + softmax along the (lane-dense) sequence axis; rows are sublane-dense.
    m = mask_ref[...]                                         # [TB, Sp]
    masked = ratio * m + (m - 1.0) * NEG_BIG
    mx = jnp.max(masked, axis=-1, keepdims=True)
    e = jnp.exp(masked - mx)
    denom = jnp.sum(e, axis=-1, keepdims=True)
    score = e * pl.reciprocal(denom, approx=True)             # [TB, Sp]  (EUP reciprocal)
    # dropout(attention_score) is identity in eval mode.

    # result[b, h] = sum_s score[b, s] * v[b, s, h]  (VPU broadcast-mul + sublane reduce).
    result = jnp.sum(v * score[:, :, None], axis=1)           # [TB, Dh]

    out_ref[...] = result
    score_ref[...] = score


# --------------------------------------------------------------------------
# Wrapper: padding / bias-fold / dtype prep + batch grid.
# --------------------------------------------------------------------------
def _round_up(x, m):
    return (x + m - 1) // m * m


def context_attention_forward(params, feature, contexts, masks, *, block_b=128):
    B, S, D = feature.shape
    Dh = params["wq"].shape[0]            # hidden_dim
    scale = float(Dh) ** (-0.5)

    # Batch tile: multiple of 8 (sublane-dense), no larger than the padded batch.
    block_b = max(8, min(_round_up(block_b, 8), _round_up(B, 8)))
    Bp = _round_up(B, block_b)
    # Sequence padding: lane-dense (128) when S is non-trivial, cheap 8-pad when tiny.
    Sp = _round_up(S, 128) if S >= 64 else _round_up(S, 8)
    D1, Dh1 = D + 1, Dh + 1
    f32, bf16 = jnp.float32, jnp.bfloat16

    # Activations: zero-pad + ones column (bias fold); bf16 for the MXU.
    # Zero/one padding is exact: padded mask positions are 0 -> exp(-1e9-..) == 0 in f32,
    # so bias-valued k/v rows at padded positions never contribute.
    feat_p = jnp.zeros((Bp, Sp, D1), bf16)
    feat_p = feat_p.at[:B, :S, :D].set(feature.astype(bf16))
    feat_p = feat_p.at[:, :, D].set(1.0)                      # ones column for bias fold
    feat2d = feat_p.reshape(Bp * Sp, D1)                      # metadata-only reshape

    ctx_p = jnp.zeros((Bp, Dh1), bf16)
    ctx_p = ctx_p.at[:B, :Dh].set(contexts.astype(bf16))
    ctx_p = ctx_p.at[:, Dh].set(1.0)

    mask_p = jnp.zeros((Bp, Sp), f32).at[:B, :S].set(masks.astype(f32))

    # PyTorch Linear weight is [out, in] -> transpose once, append bias row, fuse K/V.
    wk_t = params["wk"].T.astype(f32)                         # [D, Dh]
    wv_t = params["wv"].T.astype(f32)
    wkv = jnp.concatenate(
        [jnp.concatenate([wk_t, params["bk"][None, :].astype(f32)], axis=0),
         jnp.concatenate([wv_t, params["bv"][None, :].astype(f32)], axis=0)],
        axis=1).astype(bf16)                                  # [D+1, 2*Dh]
    wq = jnp.concatenate(
        [params["wq"].T.astype(f32), params["bq"][None, :].astype(f32)],
        axis=0).astype(bf16)                                  # [Dh+1, Dh]

    # VMEM budget: double-buffered I/O tiles + resident weights + f32 intermediates,
    # with 2x headroom, clamped to [32 MiB, 64 MiB] so it is valid on v5e/v6e/v7x.
    io_bytes = (block_b * Sp * D1 * 2 + block_b * Dh1 * 2 + block_b * Sp * 4
                + (D1 * 2 * Dh + Dh1 * Dh) * 2
                + block_b * Dh * 4 + block_b * Sp * 4)
    interm_bytes = block_b * Sp * (2 * Dh) * 4 * 3 + block_b * Sp * 4 * 6
    vmem_limit = int(min(max(2 * (2 * io_bytes + interm_bytes), 32 * 1024 * 1024),
                         64 * 1024 * 1024))

    kernel = functools.partial(context_attention_kernel, scale=scale)

    out_p, score_p = pl.pallas_call(
        kernel,
        out_shape=(jax.ShapeDtypeStruct((Bp, Dh), f32),
                   jax.ShapeDtypeStruct((Bp, Sp), f32)),
        grid_spec=pltpu.PrefetchScalarGridSpec(
            num_scalar_prefetch=0,
            grid=(Bp // block_b,),
            in_specs=[
                pl.BlockSpec((block_b * Sp, D1), lambda b: (b, 0)),   # feature (2-D slab)
                pl.BlockSpec((block_b, Dh1), lambda b: (b, 0)),       # contexts (+ ones col)
                pl.BlockSpec((block_b, Sp), lambda b: (b, 0)),        # masks
                pl.BlockSpec((D1, 2 * Dh), lambda b: (0, 0)),         # wkv (+bias row), resident
                pl.BlockSpec((Dh1, Dh), lambda b: (0, 0)),            # wq  (+bias row), resident
            ],
            out_specs=(
                pl.BlockSpec((block_b, Dh), lambda b: (b, 0)),        # result
                pl.BlockSpec((block_b, Sp), lambda b: (b, 0)),        # score
            ),
        ),
        compiler_params=pltpu.CompilerParams(
            dimension_semantics=("parallel",),
            vmem_limit_bytes=vmem_limit),
    )(feat2d, ctx_p, mask_p, wkv, wq)

    result = out_p[:B]                                # [B, Dh]
    attention_score = score_p[:B, :S][:, :, None]     # [B, S, 1]
    return result, attention_score


# --------------------------------------------------------------------------
# Pure-JAX reference (for verification)
# --------------------------------------------------------------------------
def reference_forward(params, feature, contexts, masks):
    Dh = params["wq"].shape[0]
    k = feature @ params["wk"].T + params["bk"]
    v = feature @ params["wv"].T + params["bv"]
    q = contexts @ params["wq"].T + params["bq"]
    ratio = jnp.einsum("bsd,bd->bs", k, q) * (float(Dh) ** -0.5)
    mr = ratio * masks + (masks - 1.0) * NEG_BIG
    score = jax.nn.softmax(mr, axis=-1)
    result = jnp.einsum("bs,bsd->bd", score, v)
    return result, score[:, :, None]


# --------------------------------------------------------------------------
# Deterministic parameter init (PyTorch Linear default: U(-1/sqrt(fan_in), +1/sqrt(fan_in)))
# --------------------------------------------------------------------------
def init_params(key, D, Dh):
    ks = jax.random.split(key, 6)
    u = lambda k, shape, lim: jax.random.uniform(k, shape, jnp.float32, -lim, lim)
    li = 1.0 / np.sqrt(D)
    lh = 1.0 / np.sqrt(Dh)
    return dict(
        wk=u(ks[0], (Dh, D), li), bk=u(ks[1], (Dh,), li),
        wv=u(ks[2], (Dh, D), li), bv=u(ks[3], (Dh,), li),
        wq=u(ks[4], (Dh, Dh), lh), bq=u(ks[5], (Dh,), lh),
    )


if __name__ == "__main__":
    B, S, D, Dh = 4, 8, 16, 32      # batch, seq, input_dim, hidden_size

    key = jax.random.PRNGKey(0)
    kp, kf, kc = jax.random.split(key, 3)
    params = init_params(kp, D, Dh)

    feature = jax.random.normal(kf, (B, S, D), jnp.float32)
    contexts = jax.random.normal(kc, (B, Dh), jnp.float32)
    lengths = jnp.array([8, 5, 3, 6], jnp.int32)
    masks = (jnp.arange(S)[None, :] < lengths[:, None]).astype(jnp.float32)

    fwd = jax.jit(functools.partial(context_attention_forward, params))
    result, attention_score = fwd(feature, contexts, masks)
    jax.block_until_ready((result, attention_score))

    ref_result, ref_score = reference_forward(params, feature, contexts, masks)
    assert result.shape == (B, Dh) and attention_score.shape == (B, S, 1)
    # bf16 MXU operands + approximate (EUP) reciprocal -> 2e-2 tolerance.
    assert np.allclose(np.asarray(result), np.asarray(ref_result), rtol=2e-2, atol=2e-2)
    assert np.allclose(np.asarray(attention_score), np.asarray(ref_score),
                       rtol=2e-2, atol=2e-2)

    print("KERNEL_OK")
</pallas_src>

<mosaic_0001>
module attributes {stable_mosaic.version = 11 : i64} {
  func.func @context_attention_kernel(%arg0: i32, %arg1: memref<64x17xbf16, #tpu.memory_space<vmem>>, %arg2: memref<8x33xbf16, #tpu.memory_space<vmem>>, %arg3: memref<8x8xf32, #tpu.memory_space<vmem>>, %arg4: memref<17x64xbf16, #tpu.memory_space<vmem>>, %arg5: memref<33x32xbf16, #tpu.memory_space<vmem>>, %arg6: memref<8x32xf32, #tpu.memory_space<vmem>>, %arg7: memref<8x8xf32, #tpu.memory_space<vmem>>) attributes {dimension_semantics = [#tpu.dimension_semantics<parallel>], iteration_bounds = array<i64: 1>, scalar_prefetch = 0 : i64, scratch_operands = 0 : i64, tpu.core_type = #tpu.core_type<tc>, window_params = [{transform_indices = @transform_0, window_bounds = array<i64: 64, 17>}, {transform_indices = @transform_1, window_bounds = array<i64: 8, 33>}, {transform_indices = @transform_2, window_bounds = array<i64: 8, 8>}, {pipeline_mode = #tpu.pipeline_mode<synchronous>, transform_indices = @transform_3, window_bounds = array<i64: 17, 64>}, {pipeline_mode = #tpu.pipeline_mode<synchronous>, transform_indices = @transform_4, window_bounds = array<i64: 33, 32>}, {transform_indices = @transform_5, window_bounds = array<i64: 8, 32>}, {transform_indices = @transform_6, window_bounds = array<i64: 8, 8>}]} {
    %c0 = arith.constant 0 : index
    %c0_0 = arith.constant 0 : index
    %0 = vector.load %arg1[%c0, %c0_0] : memref<64x17xbf16, #tpu.memory_space<vmem>>, vector<64x17xbf16>
    %c0_1 = arith.constant 0 : index
    %c0_2 = arith.constant 0 : index
    %1 = vector.load %arg4[%c0_1, %c0_2] : memref<17x64xbf16, #tpu.memory_space<vmem>>, vector<17x64xbf16>
    %cst = arith.constant dense<0.000000e+00> : vector<64x64xf32>
    %2 = tpu.matmul %0, %1, %cst {dimension_numbers = #tpu.dot_dimension_numbers<[1], [0], [0], [1], [0, 0, 1, 1], [], []>} : vector<64x17xbf16>, vector<17x64xbf16>, vector<64x64xf32> -> vector<64x64xf32>
    %3 = vector.extract_strided_slice %2 {offsets = [0, 0], sizes = [64, 32], strides = [1, 1]} : vector<64x64xf32> to vector<64x32xf32>
    %4 = vector.shape_cast %3 : vector<64x32xf32> to vector<8x8x32xf32>
    %5 = vector.extract_strided_slice %2 {offsets = [0, 32], sizes = [64, 32], strides = [1, 1]} : vector<64x64xf32> to vector<64x32xf32>
    %6 = vector.shape_cast %5 : vector<64x32xf32> to vector<8x8x32xf32>
    %c0_3 = arith.constant 0 : index
    %c0_4 = arith.constant 0 : index
    %7 = vector.load %arg2[%c0_3, %c0_4] : memref<8x33xbf16, #tpu.memory_space<vmem>>, vector<8x33xbf16>
    %c0_5 = arith.constant 0 : index
    %c0_6 = arith.constant 0 : index
    %8 = vector.load %arg5[%c0_5, %c0_6] : memref<33x32xbf16, #tpu.memory_space<vmem>>, vector<33x32xbf16>
    %cst_7 = arith.constant dense<0.000000e+00> : vector<8x32xf32>
    %9 = tpu.matmul %7, %8, %cst_7 {dimension_numbers = #tpu.dot_dimension_numbers<[1], [0], [0], [1], [0, 0, 1, 1], [], []>} : vector<8x33xbf16>, vector<33x32xbf16>, vector<8x32xf32> -> vector<8x32xf32>
    %10 = vector.shape_cast %9 : vector<8x32xf32> to vector<8x1x32xf32>
    %11 = vector.broadcast %10 : vector<8x1x32xf32> to vector<8x8x32xf32>
    %12 = arith.mulf %4, %11 : vector<8x8x32xf32>
    %cst_8 = arith.constant dense<0.000000e+00> : vector<8x8xf32>
    %13 = vector.multi_reduction <add>, %12, %cst_8 [2] : vector<8x8x32xf32> to vector<8x8xf32>
    %cst_9 = arith.constant 0.176776692 : f32
    %14 = vector.broadcast %cst_9 : f32 to vector<8x8xf32>
    %15 = arith.mulf %13, %14 : vector<8x8xf32>
    %c0_10 = arith.constant 0 : index
    %c0_11 = arith.constant 0 : index
    %16 = vector.load %arg3[%c0_10, %c0_11] : memref<8x8xf32, #tpu.memory_space<vmem>>, vector<8x8xf32>
    %17 = arith.mulf %15, %16 : vector<8x8xf32>
    %cst_12 = arith.constant 1.000000e+00 : f32
    %18 = vector.broadcast %cst_12 : f32 to vector<8x8xf32>
    %19 = arith.subf %16, %18 : vector<8x8xf32>
    %cst_13 = arith.constant 1.000000e+09 : f32
    %20 = vector.broadcast %cst_13 : f32 to vector<8x8xf32>
    %21 = arith.mulf %19, %20 : vector<8x8xf32>
    %22 = arith.addf %17, %21 : vector<8x8xf32>
    %cst_14 = arith.constant dense<0xFF800000> : vector<8xf32>
    %23 = vector.multi_reduction <maximumf>, %22, %cst_14 [1] : vector<8x8xf32> to vector<8xf32>
    %24 = vector.shape_cast %23 : vector<8xf32> to vector<8x1xf32>
    %25 = vector.broadcast %24 : vector<8x1xf32> to vector<8x8xf32>
    %26 = arith.subf %22, %25 : vector<8x8xf32>
    %27 = math.exp %26 : vector<8x8xf32>
    %cst_15 = arith.constant dense<0.000000e+00> : vector<8xf32>
    %28 = vector.multi_reduction <add>, %27, %cst_15 [1] : vector<8x8xf32> to vector<8xf32>
    %29 = vector.shape_cast %28 : vector<8xf32> to vector<8x1xf32>
    %30 = tpu.reciprocal %29 {approx = true} : vector<8x1xf32> -> vector<8x1xf32>
    %31 = vector.broadcast %30 : vector<8x1xf32> to vector<8x8xf32>
    %32 = arith.mulf %27, %31 : vector<8x8xf32>
    %33 = vector.shape_cast %32 : vector<8x8xf32> to vector<8x8x1xf32>
    %34 = vector.broadcast %33 : vector<8x8x1xf32> to vector<8x8x32xf32>
    %35 = arith.mulf %6, %34 : vector<8x8x32xf32>
    %cst_16 = arith.constant dense<0.000000e+00> : vector<8x32xf32>
    %36 = vector.multi_reduction <add>, %35, %cst_16 [1] : vector<8x8x32xf32> to vector<8x32xf32>
    %c0_17 = arith.constant 0 : index
    %c0_18 = arith.constant 0 : index
    %37 = vector.load %arg6[%c0_17, %c0_18] : memref<8x32xf32, #tpu.memory_space<vmem>>, vector<8x32xf32>
    tpu.vector_store %arg6[%c0_17, %c0_18], %36 {strides = array<i32>} : memref<8x32xf32, #tpu.memory_space<vmem>>, vector<8x32xf32>,
    %c0_19 = arith.constant 0 : index
    %c0_20 = arith.constant 0 : index
    %38 = vector.load %arg7[%c0_19, %c0_20] : memref<8x8xf32, #tpu.memory_space<vmem>>, vector<8x8xf32>
    tpu.vector_store %arg7[%c0_19, %c0_20], %32 {strides = array<i32>} : memref<8x8xf32, #tpu.memory_space<vmem>>, vector<8x8xf32>,
    return
  }
  func.func @transform_0(%arg0: i32) -> (i32, i32) {
    %c0_i32 = arith.constant 0 : i32
    %c0_i32_0 = arith.constant 0 : i32
    return %arg0, %c0_i32 : i32, i32
  }
  func.func @transform_1(%arg0: i32) -> (i32, i32) {
    %c0_i32 = arith.constant 0 : i32
    %c0_i32_0 = arith.constant 0 : i32
    return %arg0, %c0_i32 : i32, i32
  }
  func.func @transform_2(%arg0: i32) -> (i32, i32) {
    %c0_i32 = arith.constant 0 : i32
    %c0_i32_0 = arith.constant 0 : i32
    return %arg0, %c0_i32 : i32, i32
  }
  func.func @transform_3(%arg0: i32) -> (i32, i32) {
    %c0_i32 = arith.constant 0 : i32
    %c0_i32_0 = arith.constant 0 : i32
    %c0_i32_1 = arith.constant 0 : i32
    return %c0_i32, %c0_i32_0 : i32, i32
  }
  func.func @transform_4(%arg0: i32) -> (i32, i32) {
    %c0_i32 = arith.constant 0 : i32
    %c0_i32_0 = arith.constant 0 : i32
    %c0_i32_1 = arith.constant 0 : i32
    return %c0_i32, %c0_i32_0 : i32, i32
  }
  func.func @transform_5(%arg0: i32) -> (i32, i32) {
    %c0_i32 = arith.constant 0 : i32
    %c0_i32_0 = arith.constant 0 : i32
    return %arg0, %c0_i32 : i32, i32
  }
  func.func @transform_6(%arg0: i32) -> (i32, i32) {
    %c0_i32 = arith.constant 0 : i32
    %c0_i32_0 = arith.constant 0 : i32
    return %arg0, %c0_i32 : i32, i32
  }
}

</mosaic_0001>

<bundles_post_ra>
// kernel: context_attention_forward.1
= control target key start
LH: loop header
LB: loop body
LE: loop exit
PB: predicated region body
PF: predicated region fallthrough
CT: control target
= control target key end

     0   :  { %v220_v0 = vlaneseq  ;;  %vm76_vm0 = vcmask 1040384   ;;  %v765_v6 = vmov 0   ;;  %vm63_vm1 = vcmask 138240   ;;  %s1003_s3 = inlined_call_operand.vmem [shape: bf16[17,64], index: 3, kind: input, shape index: {}]   ;;  %s1004_s4 = inlined_call_operand.vmem [shape: bf16[33,32], index: 4, kind: input, shape index: {}]   ;;  %s1005_s2 = inlined_call_operand.vmem [shape: f32[8,8], index: 2, kind: input, shape index: {}]   ;;  %s1006_s0 = inlined_call_operand.vmem [shape: bf16[64,17], index: 0, kind: input, shape index: {}]   ;;  %s1007_s1 = inlined_call_operand.vmem [shape: bf16[8,33], index: 1, kind: input, shape index: {}]   ;;  %s1008_s6 = inlined_call_operand.vmem [shape: f32[8,8], index: 6, kind: output, shape index: {1}]   ;;  %s1009_s5 = inlined_call_operand.vmem [shape: f32[8,32], index: 5, kind: output, shape index: {0}]  }
   0x1   :  { %v33_v1 = vld [vmem:[%s1003_s3 + $0x8] sm:$0x1]  ;;  %v116_v2 = vld [vmem:[%s1004_s4 + $0x10] sm:$0x1]  ;;  %v78_v7 = vsel %vm76_vm0, 65535, %v765_v6  ;;  %v217_v12 = vld [vmem:[%s1005_s2] sm:$0xff] }
   0x2   :  { %v221_v3 = vshrl.u32 %v220_v0, 7  ;;  %v59_v4 = vunpack.c.l.b16 %v33_v1  ;;  %v126_v5 = vunpack.c.l.b16 %v116_v2  ;;  %v732_v13 = vld [vmem:[%s1003_s3] sm:$0xff]  ;;  %v734_v14 = vld [vmem:[%s1004_s4 + $0x8] sm:$0xff]  ;;  %v233_v15 = vperm.slane %v217_v12, 2  ;;  %v731_v18 = vld [vmem:[%s1006_s0 + $0x18] sm:$0xff] }
   0x3   :  { %v728_v16 = vld [vmem:[%s1006_s0] sm:$0xff]  ;;  %v729_v17 = vld [vmem:[%s1006_s0 + $0x8] sm:$0xff]  ;;  %vm132_vm2 = vcmask 269312   ;;  %v240_v21 = vperm.slane %v217_v12, 3  ;;  %v727_v22 = vadd.f32 -1.0, %v217_v12  ;;  %v730_v25 = vld [vmem:[%s1006_s0 + $0x10] sm:$0xff] }
   0x4   :  { %743 = vset.pattern.permute.xlu1 %v221_v3  ;;  %v61_v8 = vpack.c.b16 %v59_v4, %v59_v4  ;;  %v129_v9 = vpack.c.b16 %v126_v5, %v126_v5  ;;  %741 = vset.pattern.permute.xlu2 %v221_v3  ;;  %v733_v19 = vld [vmem:[%s1004_s4] sm:$0xff]  ;;  %v247_v26 = vperm.slane %v217_v12, 4  ;;  %v219_v28 = vperm.slane %v217_v12, 0 }
   0x5   :  { %742 = vset.pattern.permute.xlu0 %v221_v3  ;;  %v111_v20 = vld [vmem:[%s1007_s1] sm:$0xf]  ;;  %v837_v23 = vmul.f32 1e+09, %v727_v22  ;;  %v226_v29 = vperm.slane %v217_v12, 1  ;;  %v254_v31 = vperm.slane %v217_v12, 5 }
   0x6   :  { %v80_v10 = vand.u32 %v78_v7, %v61_v8  ;;  %v137_v11 = vand.u32 %v129_v9, %v78_v7  ;;  %v261_v33 = vperm.slane %v217_v12, 6  ;;  %v268_v34 = vperm.slane %v217_v12, 7 }
   0x7   :  { %v301_v24 = vperm.slane %v837_v23, 1  ;;  %v308_v27 = vperm.slane %v837_v23, 2  ;;  %v315_v30 = vperm.slane %v837_v23, 3  ;;  %v294_v32 = vperm.slane %v837_v23, 0 }
   0x8   :  { %88 = vmatpush.bf16.msra.mxu0 %v80_v10  ;;  %735 = vmatpush.bf16.msra.mxu2 %v80_v10  ;;  %v322_v35 = vperm.slane %v837_v23, 4  ;;  %v336_v36 = vperm.slane %v837_v23, 6  ;;  %v329_v37 = vperm.slane %v837_v23, 5  ;;  %vm184_vm3 = vcmask 261120  }
   0x9   :  { %736 = vmatpush.bf16.msra.mxu3 %v80_v10  ;;  %144 = vmatpush.bf16.msra.mxu1 %v137_v11  ;;  %vm408_vm4 = vcmask 1041409   ;;  %vm410_vm5 = vcmask 1042434   ;;  %vm412_vm6 = vcmask 1043459   ;;  %vm414_vm7 = vcmask 1044484  }
   0xa   :  { %vm416_vm8 = vcmask 1045509   ;;  %vm418_vm9 = vcmask 1046534   ;;  %vm420_vm10 = vcmask 1047559   ;;  %vm423_vm11 = vcmask 64512  }
   0xb   :  { %vm593_vm12 = vcmask 523520  }
   0xc   :  { %89 = vmatpush.bf16.msra.mxu0 %v732_v13  ;;  %737 = vmatpush.bf16.msra.mxu2 %v732_v13 }
   0xd   :  { %738 = vmatpush.bf16.msra.mxu3 %v732_v13  ;;  %145 = vmatpush.bf16.msra.mxu1 %v734_v14 }
   0xe   :  { %238 = vperm.xlu1 %743, %v233_v15   ;;  %224 = vperm.xlu2 %741, %v219_v28  }
   0xf   :  { %714 = vmatmul.msk.bf16.vlgmr.msra.gmra.mxu0 %vm63_vm1, %v728_v16  ;;  %715 = vmatmul.msk.bf16.vlgmr.msra.gmra.mxu2 %vm63_vm1, %v729_v17 }
  0x10   :  { %717 = vmatmul.msk.bf16.vlgmr.msra.gmra.mxu3 %vm63_vm1, %v731_v18  ;;  %231 = vperm.xlu0 %742, %v226_v29   ;;  %v343_v18 = vperm.slane %v837_v23, 7 }
  0x11   :  { %146 = vmatpush.bf16.msra.mxu1 %v733_v19 }
  0x14   :  { %726 = vmatmul.msk.bf16.vlgmr.msra.gmra.mxu1 %vm132_vm2, %v111_v20 }
  0x16   :  { %245 = vperm.xlu1 %743, %v240_v21   ;;  %259 = vperm.xlu2 %741, %v254_v31  }
  0x18   :  { %299 = vperm.xlu0 %742, %v294_v32  }
  0x1e   :  { %306 = vperm.xlu1 %743, %v301_v24   ;;  %273 = vperm.xlu2 %741, %v268_v34  }
  0x1f   :  { %716 = vmatmul.msk.bf16.gmra.mxu2 %vm63_vm1, %v730_v25 }
  0x26   :  { %252 = vperm.xlu1 %743, %v247_v26   ;;  %341 = vperm.xlu2 %741, %v336_v36  }
  0x2e   :  { %313 = vperm.xlu1 %743, %v308_v27   ;;  %745 = vset.pattern.permute.xlu2 %v765_v6 }
  0x36   :  { %320 = vperm.xlu1 %743, %v315_v30  }
  0x3e   :  { %266 = vperm.xlu1 %743, %v261_v33  }
  0x46   :  { %327 = vperm.xlu1 %743, %v322_v35  }
  0x4e   :  { %334 = vperm.xlu1 %743, %v329_v37  }
  0x56   :  { %744 = vset.pattern.permute.xlu1 %v765_v6 }
  0x68   :  { %v225_v25 = vpop.permute.xlu2 %224 }
  0x70   :  { %v260_v27 = vpop.permute.xlu2 %259 }
  0x78   :  { %v274_v30 = vpop.permute.xlu2 %273 }
  0x80   :  { %v239_v17 = vpop.permute.xlu1 %238  ;;  %v342_v33 = vpop.permute.xlu2 %341 }
  0x82   :  { %v232_v28 = vpop.permute.xlu0 %231 }
  0x88   :  { %v246_v19 = vpop.permute.xlu1 %245 }
  0x8a   :  { %v300_v31 = vpop.permute.xlu0 %299 }
  0x8c   :  { %v852_v38 = vpop.f32.mrf.mxu0 }
  0x90   :  { %v307_v20 = vpop.permute.xlu1 %306 }
  0x91   :  { %v148_v39 = vpop.f32.mrf.mxu1 }
  0x92   :  { %v854_v40 = vpop.f32.mrf.mxu2  ;;  %v154_v41 = vrot.slane %v148_v39, 2  ;;  %v158_v42 = vrot.slane %v148_v39, 6  ;;  %v153_v43 = vrot.slane %v148_v39, 1  ;;  %v160_v44 = vperm.slane %v148_v39, 0 }
  0x93   :  { %v857_v48 = vpop.f32.mrf.mxu3  ;;  %v155_v49 = vrot.slane %v148_v39, 3  ;;  %v159_v62 = vrot.slane %v148_v39, 7  ;;  %v156_v63 = vrot.slane %v148_v39, 4  ;;  %v157_v11 = vrot.slane %v148_v39, 5 }
  0x94   :  { %v162_v45 = vperm.slane %v154_v41, 0  ;;  %v166_v46 = vperm.slane %v158_v42, 0  ;;  %v176_v47 = vmul.f32 %v160_v44, %v852_v38  ;;  %v161_v52 = vperm.slane %v153_v43, 0  ;;  %v862_v54 = vpop.f32.mrf.mxu0 }
  0x95   :  { %v163_v60 = vperm.slane %v155_v49, 0  ;;  %v167_v3 = vperm.slane %v159_v62, 0  ;;  %v164_v5 = vperm.slane %v156_v63, 0  ;;  %v165_v13 = vperm.slane %v157_v11, 0 }
  0x96   :  { %v178_v50 = vmul.f32 %v162_v45, %v854_v40  ;;  %v182_v51 = vmul.f32 %v166_v46, %v857_v48  ;;  %v185_v53 = vsel %vm184_vm3, %v176_v47, 0.0  ;;  %v177_v58 = vmul.f32 %v161_v52, %v862_v54 }
  0x97   :  { %186 = vadd.xlane.f32.xlu0 %v185_v53 }
  0x98   :  { %v203_v55 = vsel %vm184_vm3, %v182_v51, 0.0  ;;  %v191_v56 = vsel %vm184_vm3, %v178_v50, 0.0  ;;  %v188_v1 = vsel %vm184_vm3, %v177_v58, 0.0  ;;  %v253_v21 = vpop.permute.xlu1 %252 }
  0x99   :  { %v150_v57 = vpop.f32.mrf.mxu1  ;;  %204 = vadd.xlane.f32.xlu2 %v203_v55  ;;  %192 = vadd.xlane.f32.xlu1 %v191_v56 }
  0x9a   :  { %v867_v59 = vpop.f32.mrf.mxu2 }
  0x9b   :  { %v179_v61 = vmul.f32 %v163_v60, %v867_v59  ;;  %v871_v2 = vpop.f32.mrf.mxu3 }
  0x9c   :  { %v183_v7 = vmul.f32 %v167_v3, %v871_v2 }
  0x9d   :  { %v194_v4 = vsel %vm184_vm3, %v179_v61, 0.0 }
  0x9e   :  { %v206_v12 = vsel %vm184_vm3, %v183_v7, 0.0 }
  0x9f   :  { %189 = vadd.xlane.f32.xlu0 %v188_v1 }
  0xa0   :  { %v314_v22 = vpop.permute.xlu1 %313 }
  0xa1   :  { %195 = vadd.xlane.f32.xlu1 %v194_v4 }
  0xa2   :  { %v875_v8 = vpop.f32.mrf.mxu2 }
  0xa3   :  { %v180_v9 = vmul.f32 %v164_v5, %v875_v8 }
  0xa5   :  { %v197_v10 = vsel %vm184_vm3, %v180_v9, 0.0 }
  0xa6   :  { %198 = vadd.xlane.f32.xlu2 %v197_v10 }
  0xa7   :  { %207 = vadd.xlane.f32.xlu0 %v206_v12 }
  0xa8   :  { %v321_v24 = vpop.permute.xlu1 %320 }
  0xaa   :  { %v880_v14 = vpop.f32.mrf.mxu2 }
  0xab   :  { %v181_v15 = vmul.f32 %v165_v13, %v880_v14  ;;  %v908_v13 = vand.u32 127, %v220_v0 }
  0xad   :  { %v200_v16 = vsel %vm184_vm3, %v181_v15, 0.0 }
  0xae   :  { %201 = vadd.xlane.f32.xlu1 %v200_v16 }
  0xb0   :  { %v267_v26 = vpop.permute.xlu1 %266 }
  0xb8   :  { %v328_v29 = vpop.permute.xlu1 %327 }
  0xbb   :  { %348 = vperm.xlu0 %742, %v343_v18  }
  0xc0   :  { %v335_v32 = vpop.permute.xlu1 %334 }
  0xc3   :  { %746 = vset.pattern.permute.xlu0 %v765_v6 }
 0x10a   :  { %v187_v34 = vpop.xlane.xlu0 %186 }
 0x10b   :  { %v209_v35 = vmul.f32 0.17677669, %v187_v34 }
 0x10c   :  { %v193_v23 = vpop.xlane.xlu1 %192  ;;  %v205_v6 = vpop.xlane.xlu2 %204 }
 0x10d   :  { %v283_v36 = vmul.f32 %v225_v25, %v209_v35  ;;  %v211_v37 = vmul.f32 0.17677669, %v193_v23  ;;  %v215_v56 = vmul.f32 0.17677669, %v205_v6 }
 0x10f   :  { %v886_v39 = vadd.f32 %v300_v31, %v283_v36  ;;  %v285_v42 = vmul.f32 %v239_v17, %v211_v37  ;;  %v289_v61 = vmul.f32 %v267_v26, %v215_v56 }
 0x111   :  { %375 = vperm.xlu1 %744, %v886_v39   ;;  %v889_v47 = vadd.f32 %v314_v22, %v285_v42  ;;  %v900_v3 = vadd.f32 %v342_v33, %v289_v61 }
 0x112   :  { %v190_v41 = vpop.xlane.xlu0 %189 }
 0x113   :  { %v210_v43 = vmul.f32 0.17677669, %v190_v41 }
 0x114   :  { %v196_v44 = vpop.xlane.xlu1 %195 }
 0x115   :  { %v284_v45 = vmul.f32 %v232_v28, %v210_v43  ;;  %v212_v46 = vmul.f32 0.17677669, %v196_v44 }
 0x117   :  { %v891_v49 = vadd.f32 %v307_v20, %v284_v45  ;;  %v286_v52 = vmul.f32 %v246_v19, %v212_v46 }
 0x119   :  { %381 = vperm.xlu1 %744, %v889_v47   ;;  %378 = vperm.xlu2 %745, %v891_v49   ;;  %v199_v50 = vpop.xlane.xlu2 %198  ;;  %v361_v57 = vadd.f32 %v321_v24, %v286_v52 }
 0x11a   :  { %v213_v51 = vmul.f32 0.17677669, %v199_v50  ;;  %v208_v63 = vpop.xlane.xlu0 %207 }
 0x11b   :  { %v216_v4 = vmul.f32 0.17677669, %v208_v63 }
 0x11c   :  { %v287_v53 = vmul.f32 %v253_v21, %v213_v51 }
 0x11d   :  { %v290_v5 = vmul.f32 %v274_v30, %v216_v4 }
 0x11e   :  { %v895_v55 = vadd.f32 %v328_v29, %v287_v53 }
 0x120   :  { %387 = vperm.xlu0 %746, %v895_v55  }
 0x121   :  { %384 = vperm.xlu2 %745, %v361_v57   ;;  %v202_v58 = vpop.xlane.xlu1 %201 }
 0x122   :  { %v214_v60 = vmul.f32 0.17677669, %v202_v58 }
 0x124   :  { %v288_v62 = vmul.f32 %v260_v27, %v214_v60 }
 0x126   :  { %v898_v1 = vadd.f32 %v335_v32, %v288_v62 }
 0x128   :  { %390 = vperm.xlu1 %744, %v898_v1  }
 0x129   :  { %393 = vperm.xlu2 %745, %v900_v3  }
 0x12d   :  { %v349_v7 = vpop.permute.xlu0 %348 }
 0x12e   :  { %v904_v9 = vadd.f32 %v349_v7, %v290_v5 }
 0x130   :  { %396 = vperm.xlu1 %744, %v904_v9  }
 0x173   :  { %v379_v11 = vpop.permute.xlu2 %378 }
 0x174   :  { %v401_v18 = vperm.slane %v379_v11, %v908_v13 }
 0x17b   :  { %v385_v15 = vpop.permute.xlu2 %384 }
 0x17c   :  { %v403_v0 = vperm.slane %v385_v15, %v908_v13 }
 0x183   :  { %v376_v10 = vpop.permute.xlu1 %375  ;;  %v394_v26 = vpop.permute.xlu2 %393 }
 0x184   :  { %v400_v16 = vperm.slane %v376_v10, %v908_v13  ;;  %v406_v30 = vperm.slane %v394_v26, %v908_v13 }
 0x186   :  { %v409_v21 = vsel %vm408_vm4, %v401_v18, %v400_v16 }
 0x18b   :  { %v382_v12 = vpop.permute.xlu1 %381 }
 0x18c   :  { %v402_v17 = vperm.slane %v382_v12, %v908_v13 }
 0x18e   :  { %v411_v22 = vsel %vm410_vm5, %v402_v17, %v409_v21 }
 0x18f   :  { %v413_v27 = vsel %vm412_vm6, %v403_v0, %v411_v22 }
 0x192   :  { %v388_v19 = vpop.permute.xlu0 %387 }
 0x193   :  { %v404_v24 = vperm.slane %v388_v19, %v908_v13 }
 0x195   :  { %v415_v28 = vsel %vm414_vm7, %v404_v24, %v413_v27 }
 0x19a   :  { %v391_v20 = vpop.permute.xlu1 %390 }
 0x19b   :  { %v405_v25 = vperm.slane %v391_v20, %v908_v13 }
 0x19d   :  { %v417_v29 = vsel %vm416_vm8, %v405_v25, %v415_v28 }
 0x19e   :  { %v419_v33 = vsel %vm418_vm9, %v406_v30, %v417_v29 }
 0x1a2   :  { %v397_v31 = vpop.permute.xlu1 %396 }
 0x1a3   :  { %v407_v32 = vperm.slane %v397_v31, %v908_v13 }
 0x1a5   :  { %v421_v34 = vsel %vm420_vm10, %v407_v32, %v419_v33 }
 0x1a6   :  { %v424_v35 = vsel %vm423_vm11, %v421_v34, -inf }
 0x1a7   :  { %425 = vmax.xlane.f32.xlu2 %v424_v35 }
 0x21a   :  { %v426_v23 = vpop.xlane.xlu2 %425 }
 0x21b   :  { %v429_v36 = vperm.slane %v426_v23, 1  ;;  %v428_v37 = vperm.slane %v426_v23, 0  ;;  %v431_v42 = vperm.slane %v426_v23, 3  ;;  %v430_v43 = vperm.slane %v426_v23, 2 }
 0x21c   :  { %v433_v52 = vperm.slane %v426_v23, 5  ;;  %v432_v56 = vperm.slane %v426_v23, 4  ;;  %v435_v62 = vperm.slane %v426_v23, 7  ;;  %v434_v63 = vperm.slane %v426_v23, 6 }
 0x21d   :  { %v445_v6 = vsub.f32 %v891_v49, %v429_v36  ;;  %v444_v41 = vsub.f32 %v886_v39, %v428_v37  ;;  %v447_v46 = vsub.f32 %v361_v57, %v431_v42  ;;  %v446_v50 = vsub.f32 %v889_v47, %v430_v43 }
 0x21e   :  { %v449_v39 = vsub.f32 %v898_v1, %v433_v52  ;;  %v448_v49 = vsub.f32 %v895_v55, %v432_v56  ;;  %v451_v5 = vsub.f32 %v904_v9, %v435_v62  ;;  %v450_v7 = vsub.f32 %v900_v3, %v434_v63 }
 0x21f   :  { %v454_v44 = vmul.f32 1.442695, %v445_v6  ;;  %v452_v45 = vmul.f32 1.442695, %v444_v41  ;;  %v458_v51 = vmul.f32 1.442695, %v447_v46 }
 0x220   :  { %v456_v53 = vmul.f32 1.442695, %v446_v50  ;;  %v462_v61 = vmul.f32 1.442695, %v449_v39  ;;  %v460_v57 = vmul.f32 1.442695, %v448_v49 }
 0x221   :  { %747 = vpow2.f32 %v454_v44  ;;  %v466_v1 = vmul.f32 1.442695, %v451_v5  ;;  %v464_v10 = vmul.f32 1.442695, %v450_v7 }
 0x222   :  { %749 = vpow2.f32 %v452_v45 }
 0x223   :  { %751 = vpow2.f32 %v458_v51 }
 0x224   :  { %753 = vpow2.f32 %v456_v53 }
 0x225   :  { %755 = vpow2.f32 %v462_v61 }
 0x226   :  { %757 = vpow2.f32 %v460_v57 }
 0x227   :  { %v748_v58 = vpop.eup %747  ;;  %759 = vpow2.f32 %v466_v1 }
 0x228   :  { %v750_v60 = vpop.eup %749  ;;  %480 = vperm.xlu1 %744, %v748_v58   ;;  %761 = vpow2.f32 %v464_v10 }
 0x229   :  { %477 = vperm.xlu0 %746, %v750_v60   ;;  %v931_v4 = vpop.eup %751 }
 0x22a   :  { %v754_v47 = vpop.eup %753 }
 0x22b   :  { %v756_v11 = vpop.eup %755 }
 0x22c   :  { %v758_v55 = vpop.eup %757 }
 0x22d   :  { %v760_v12 = vpop.eup %759 }
 0x22e   :  { %v762_v15 = vpop.eup %761 }
 0x230   :  { %486 = vperm.xlu1 %744, %v931_v4  }
 0x231   :  { %483 = vperm.xlu0 %746, %v754_v47  }
 0x238   :  { %492 = vperm.xlu1 %744, %v756_v11  }
 0x239   :  { %489 = vperm.xlu0 %746, %v758_v55  }
 0x240   :  { %498 = vperm.xlu1 %744, %v760_v12  }
 0x241   :  { %495 = vperm.xlu0 %746, %v762_v15  }
 0x29a   :  { %v481_v16 = vpop.permute.xlu1 %480 }
 0x29b   :  { %v478_v17 = vpop.permute.xlu0 %477  ;;  %v501_v9 = vperm.slane %v481_v16, %v908_v13 }
 0x29c   :  { %v500_v3 = vperm.slane %v478_v17, %v908_v13 }
 0x29e   :  { %v508_v24 = vsel %vm408_vm4, %v501_v9, %v500_v3 }
 0x2a2   :  { %v487_v18 = vpop.permute.xlu1 %486 }
 0x2a3   :  { %v484_v19 = vpop.permute.xlu0 %483  ;;  %v503_v0 = vperm.slane %v487_v18, %v908_v13 }
 0x2a4   :  { %v502_v20 = vperm.slane %v484_v19, %v908_v13 }
 0x2a6   :  { %v509_v25 = vsel %vm410_vm5, %v502_v20, %v508_v24 }
 0x2a7   :  { %v510_v28 = vsel %vm412_vm6, %v503_v0, %v509_v25 }
 0x2aa   :  { %v493_v21 = vpop.permute.xlu1 %492 }
 0x2ab   :  { %v490_v22 = vpop.permute.xlu0 %489  ;;  %v505_v27 = vperm.slane %v493_v21, %v908_v13 }
 0x2ac   :  { %v504_v26 = vperm.slane %v490_v22, %v908_v13 }
 0x2ae   :  { %v511_v29 = vsel %vm414_vm7, %v504_v26, %v510_v28 }
 0x2af   :  { %v512_v34 = vsel %vm416_vm8, %v505_v27, %v511_v29 }
 0x2b2   :  { %v499_v30 = vpop.permute.xlu1 %498 }
 0x2b3   :  { %v507_v31 = vperm.slane %v499_v30, %v908_v13  ;;  %v496_v32 = vpop.permute.xlu0 %495 }
 0x2b4   :  { %v506_v33 = vperm.slane %v496_v32, %v908_v13 }
 0x2b6   :  { %v513_v35 = vsel %vm418_vm9, %v506_v33, %v512_v34 }
 0x2b7   :  { %v514_v23 = vsel %vm420_vm10, %v507_v31, %v513_v35 }
 0x2b8   :  { %v516_v36 = vsel %vm423_vm11, %v514_v23, 0.0 }
 0x2b9   :  { %517 = vadd.xlane.f32.xlu0 %v516_v36 }
 0x32c   :  { %v518_v37 = vpop.xlane.xlu0 %517 }
 0x32d   :  { %763 = vrcp.f32 %v518_v37 }
 0x333   :  { %v764_v6 = vpop.eup %763 }
 0x334   :  { %v522_v41 = vperm.slane %v764_v6, 1  ;;  %v521_v42 = vperm.slane %v764_v6, 0  ;;  %v526_v45 = vperm.slane %v764_v6, 5  ;;  %v523_v46 = vperm.slane %v764_v6, 2 }
 0x335   :  { %v528_v52 = vperm.slane %v764_v6, 7  ;;  %v524_v53 = vperm.slane %v764_v6, 3  ;;  %v525_v49 = vperm.slane %v764_v6, 4 }
 0x336   :  { %v538_v43 = vmul.f32 %v748_v58, %v522_v41  ;;  %v537_v44 = vmul.f32 %v750_v60, %v521_v42  ;;  %v542_v50 = vmul.f32 %v756_v11, %v526_v45  ;;  %v539_v51 = vmul.f32 %v754_v47, %v523_v46 }
 0x337   :  { %v544_v56 = vmul.f32 %v760_v12, %v528_v52  ;;  %v540_v39 = vmul.f32 %v931_v4, %v524_v53  ;;  %v541_v61 = vmul.f32 %v758_v55, %v525_v49  ;;  %v527_v58 = vperm.slane %v764_v6, 6 }
 0x338   :  { %552 = vperm.xlu2 %745, %v538_v43   ;;  %547 = vperm.xlu1 %744, %v537_v44  }
 0x339   :  { %v543_v60 = vmul.f32 %v762_v15, %v527_v58 }
 0x340   :  { %572 = vperm.xlu2 %745, %v542_v50   ;;  %557 = vperm.xlu1 %744, %v539_v51  }
 0x348   :  { %582 = vperm.xlu2 %745, %v544_v56   ;;  %562 = vperm.xlu1 %744, %v540_v39  }
 0x350   :  { %567 = vperm.xlu1 %744, %v541_v61  }
 0x358   :  { %577 = vperm.xlu1 %744, %v543_v60  }
 0x392   :  { %v553_v62 = vpop.permute.xlu2 %552 }
 0x393   :  { %v586_v5 = vmul.f32 %v553_v62, %v862_v54 }
 0x395   :  { %v601_v1 = vsel %vm593_vm12, %v586_v5, 0.0 }
 0x396   :  { %v602_v55 = vrot.slane %v601_v1, 4 }
 0x398   :  { %v603_v19 = vadd.f32 %v602_v55, %v601_v1 }
 0x39a   :  { %v953_v63 = vpop.permute.xlu2 %572  ;;  %v604_v24 = vrot.slane %v603_v19, 2 }
 0x39b   :  { %v590_v54 = vmul.f32 %v953_v63, %v880_v14  ;;  %v674_v51 = vperm.slane %v953_v63, %v908_v13 }
 0x39c   :  { %v605_v35 = vadd.f32 %v604_v24, %v603_v19 }
 0x39d   :  { %v629_v20 = vsel %vm593_vm12, %v590_v54, 0.0 }
 0x39e   :  { %v630_v26 = vrot.slane %v629_v20, 4  ;;  %v606_v50 = vrot.slane %v605_v35, 1 }
 0x3a0   :  { %v631_v37 = vadd.f32 %v630_v26, %v629_v20 }
 0x3a2   :  { %v583_v15 = vpop.permute.xlu2 %582  ;;  %v632_v56 = vrot.slane %v631_v37, 2 }
 0x3a3   :  { %v676_v58 = vperm.slane %v583_v15, %v908_v13 }
 0x3aa   :  { %v548_v57 = vpop.permute.xlu1 %547 }
 0x3ab   :  { %v585_v7 = vmul.f32 %v548_v57, %v852_v38 }
 0x3ad   :  { %v594_v10 = vsel %vm593_vm12, %v585_v7, 0.0 }
 0x3ae   :  { %v595_v16 = vrot.slane %v594_v10, 4 }
 0x3b0   :  { %v596_v3 = vadd.f32 %v595_v16, %v594_v10 }
 0x3b2   :  { %v558_v47 = vpop.permute.xlu1 %557  ;;  %v597_v14 = vrot.slane %v596_v3, 2 }
 0x3b3   :  { %v587_v4 = vmul.f32 %v558_v47, %v854_v40  ;;  %v592_v40 = vmul.f32 %v583_v15, %v871_v2  ;;  %v671_v27 = vperm.slane %v558_v47, %v908_v13  ;;  %v670_v2 = vperm.slane %v553_v62, %v908_v13 }
 0x3b4   :  { %v598_v6 = vadd.f32 %v597_v14, %v596_v3 }
 0x3b5   :  { %v608_v11 = vsel %vm593_vm12, %v587_v4, 0.0  ;;  %v643_v0 = vsel %vm593_vm12, %v592_v40, 0.0 }
 0x3b6   :  { %v609_v18 = vrot.slane %v608_v11, 4  ;;  %v644_v31 = vrot.slane %v643_v0, 4  ;;  %v599_v39 = vrot.slane %v598_v6, 1 }
 0x3b8   :  { %v610_v21 = vadd.f32 %v609_v18, %v608_v11  ;;  %v645_v44 = vadd.f32 %v644_v31, %v643_v0  ;;  %v633_v11 = vadd.f32 %v632_v56, %v631_v37 }
 0x3ba   :  { %v563_v12 = vpop.permute.xlu1 %562  ;;  %v611_v29 = vrot.slane %v610_v21, 2  ;;  %v646_v47 = vrot.slane %v645_v44, 2  ;;  %v634_v18 = vrot.slane %v633_v11, 1 }
 0x3bb   :  { %v588_v17 = vmul.f32 %v563_v12, %v867_v59  ;;  %v669_v59 = vperm.slane %v548_v57, %v908_v13  ;;  %v672_v30 = vperm.slane %v563_v12, %v908_v13  ;;  %v607_v12 = vadd.f32 %v606_v50, %v605_v35 }
 0x3bc   :  { %v647_v15 = vadd.f32 %v646_v47, %v645_v44 }
 0x3bd   :  { %v615_v38 = vsel %vm593_vm12, %v588_v17, 0.0  ;;  %v677_v23 = vsel %vm408_vm4, %v670_v2, %v669_v59 }
 0x3be   :  { %v616_v9 = vrot.slane %v615_v38, 4  ;;  %v678_v41 = vsel %vm410_vm5, %v671_v27, %v677_v23 }
 0x3bf   :  { %v679_v42 = vsel %vm412_vm6, %v672_v30, %v678_v41 }
 0x3c0   :  { %v617_v22 = vadd.f32 %v616_v9, %v615_v38  ;;  %v648_v9 = vrot.slane %v647_v15, 1 }
 0x3c2   :  { %v568_v25 = vpop.permute.xlu1 %567  ;;  %v618_v32 = vrot.slane %v617_v22, 2  ;;  %v649_v0 = vadd.f32 %v648_v9, %v647_v15 }
 0x3c3   :  { %v589_v28 = vmul.f32 %v568_v25, %v875_v8  ;;  %v673_v34 = vperm.slane %v568_v25, %v908_v13  ;;  %v612_v8 = vadd.f32 %v611_v29, %v610_v21 }
 0x3c4   :  { %v619_v45 = vadd.f32 %v618_v32, %v617_v22  ;;  %v635_v22 = vadd.f32 %v634_v18, %v633_v11 }
 0x3c5   :  { %v622_v33 = vsel %vm593_vm12, %v589_v28, 0.0  ;;  %v680_v46 = vsel %vm414_vm7, %v673_v34, %v679_v42  ;;  %v613_v60 = vrot.slane %v612_v8, 1 }
 0x3c6   :  { %v623_v36 = vrot.slane %v622_v33, 4  ;;  %v681_v57 = vsel %vm416_vm8, %v674_v51, %v680_v46  ;;  %v620_v5 = vrot.slane %v619_v45, 1 }
 0x3c8   :  { %v624_v43 = vadd.f32 %v623_v36, %v622_v33  ;;  %v621_v16 = vadd.f32 %v620_v5, %v619_v45 }
 0x3ca   :  { %v625_v52 = vrot.slane %v624_v43, 2  ;;  %v578_v53 = vpop.permute.xlu1 %577 }
 0x3cb   :  { %v591_v49 = vmul.f32 %v578_v53, %v857_v48  ;;  %v675_v61 = vperm.slane %v578_v53, %v908_v13  ;;  %v600_v48 = vadd.f32 %v599_v39, %v598_v6  ;;  %v614_v13 = vadd.f32 %v613_v60, %v612_v8 }
 0x3cc   :  { %v626_v62 = vadd.f32 %v625_v52, %v624_v43 }
 0x3cd   :  { %v636_v7 = vsel %vm593_vm12, %v591_v49, 0.0  ;;  %v682_v63 = vsel %vm418_vm9, %v675_v61, %v681_v57  ;;  %v658_v38 = vsel %vm408_vm4, %v607_v12, %v600_v48 }
 0x3ce   :  { %v627_v4 = vrot.slane %v626_v62, 1  ;;  %v637_v1 = vrot.slane %v636_v7, 4  ;;  %v683_v10 = vsel %vm420_vm10, %v676_v58, %v682_v63  ;;  %v659_v40 = vsel %vm410_vm5, %v614_v13, %v658_v38 }
 0x3cf   :  { %685 = vst.msk [vmem:[%s1008_s6] sm:$0xff] %vm423_vm11, %v683_v10  ;;  %v660_v3 = vsel %vm412_vm6, %v621_v16, %v659_v40  ;;  %s766_s6 = smov 96  }
 0x3d0   :  { %v638_v55 = vadd.f32 %v637_v1, %v636_v7  ;;  %v628_v17 = vadd.f32 %v627_v4, %v626_v62 }
 0x3d2   :  { %v639_v54 = vrot.slane %v638_v55, 2  ;;  %v661_v21 = vsel %vm414_vm7, %v628_v17, %v660_v3 }
 0x3d3   :  { %v662_v59 = vsel %vm416_vm8, %v635_v22, %v661_v21 }
 0x3d4   :  { %v640_v19 = vadd.f32 %v639_v54, %v638_v55 }
 0x3d6   :  { %v641_v20 = vrot.slane %v640_v19, 1 }
 0x3d8   :  { %v642_v24 = vadd.f32 %v641_v20, %v640_v19 }
 0x3da   :  { %v663_v25 = vsel %vm418_vm9, %v642_v24, %v662_v59 }
 0x3db   :  { %v664_v26 = vsel %vm420_vm10, %v649_v0, %v663_v25 }
 0x3dc   :  { %665 = vrot.lane.b32.xlu0 %v664_v26, %s766_s6 }
 0x44e   :  { %v666_v14 = vpop.permute.xlu0 %665 }
 0x44f   :  { %668 = vst.msk [vmem:[%s1009_s5] sm:$0xff] %vm184_vm3, %v666_v14 }

</bundles_post_ra>
